<compile_context>
chip_gen: v7x
topology: tpu7x:2x2x1
jax: 0.10.0
libtpu: 0.0.40
codegen_flags: <defaults>
</compile_context>

<pallas_src>
import functools

import jax
import jax.numpy as jnp
from jax.experimental import pallas as pl
from jax.experimental.pallas import tpu as pltpu


def _round_up(n, m):
    return ((n + m - 1) // m) * m


# ----------------------------------------------------------------------------
# Fused Pallas kernel: all hidden layers + output layer in one invocation
# ----------------------------------------------------------------------------
def _dlgn_fused_kernel(*refs, beta, num_hidden_layers, pwc, matmul_dtype):
    """Fused DLGN forward for one batch tile.

    refs (pwc):      g0, Wg(L,P,P), bg(L,1,P), Wv(L+1,P,P), gs_out, v_out
    refs (non-pwc):  g0, v0, Wg, bg, Wv, gs_out, v_out

    For every hidden layer i (statically unrolled, weights indexed statically):
        gate_score = g @ Wg[i] + bg[i]               (f32 accumulate on MXU)
        gate       = sigmoid(beta * gate_score)      (f32 on EUP/VPU)
        v          = (v @ Wv[i]) * gate
        g          = gate_score
    Final layer:  v_out[L] = v @ Wv[L]               (no bias, no gate)
    """
    if pwc:
        g0_ref, wg_ref, bg_ref, wv_ref, gs_out_ref, v_out_ref = refs
        v = None
    else:
        g0_ref, v0_ref, wg_ref, bg_ref, wv_ref, gs_out_ref, v_out_ref = refs
        v = v0_ref[...]

    g = g0_ref[...]  # (TB, P) float32

    for i in range(num_hidden_layers):
        # Gate path matmul: f32 accumulation regardless of operand dtype.
        gs = jnp.dot(g.astype(matmul_dtype), wg_ref[i].astype(matmul_dtype),
                     preferred_element_type=jnp.float32) + bg_ref[i]
        gate = jax.nn.sigmoid(beta * gs)  # all elementwise math in f32

        if i == 0 and pwc:
            # values[0] is all-ones: ones @ Wv == column-sum of Wv.
            # Padded rows of Wv are zero, so the sum is exact.  Saves one MXU
            # pass and the DMA of a (TB, P) ones tensor (XLU slot is idle).
            v_lin = jnp.broadcast_to(
                jnp.sum(wv_ref[0].astype(jnp.float32), axis=0, keepdims=True),
                gs.shape)
        else:
            v_lin = jnp.dot(v.astype(matmul_dtype), wv_ref[i].astype(matmul_dtype),
                            preferred_element_type=jnp.float32)

        v = v_lin * gate
        gs_out_ref[i] = gs.astype(gs_out_ref.dtype)
        v_out_ref[i] = v.astype(v_out_ref.dtype)
        g = gs

    # Final value layer (no bias, no gate).
    v_final = jnp.dot(v.astype(matmul_dtype),
                      wv_ref[num_hidden_layers].astype(matmul_dtype),
                      preferred_element_type=jnp.float32)
    v_out_ref[num_hidden_layers] = v_final.astype(v_out_ref.dtype)


# ----------------------------------------------------------------------------
# Wrapper: padding, weight stacking, single pallas_call, un-padding
# ----------------------------------------------------------------------------
def dlgn_fc_forward(x, gating_weights, gating_biases, value_weights,
                    beta=30.0, mode='pwc', matmul_dtype=jnp.float32):
    """Mirrors DLGN_FC.forward.

    Returns (values, gate_scores) as Python lists of jnp arrays:
      gate_scores = [x, g1, ..., gH]
      values      = [ones_like(x) (pwc) or x, v1, ..., vH, v_out]
    """
    L = len(gating_weights)
    assert L >= 1, "fused kernel expects at least one hidden layer"
    assert len(value_weights) == L + 1

    B, input_dim = x.shape
    num_nodes = ([input_dim] + [int(w.shape[1]) for w in gating_weights]
                 + [int(value_weights[-1].shape[1])])

    # Lane-dense feature slab (multiple of 128) shared by every layer.
    P = _round_up(max(num_nodes), 128)

    # Batch tiling: multiple of 8 sublanes; "parallel" grid axis for v7x's
    # two TensorCores (single tile at small batch → grid of 1 elsewhere).
    BP = _round_up(B, 8)
    TB = BP if BP <= 512 else 512
    BP = _round_up(BP, TB)
    nb = BP // TB

    f32 = jnp.float32
    x_p = jnp.pad(x.astype(f32), ((0, BP - B), (0, P - input_dim)))

    def pad_w(w):
        return jnp.pad(w.astype(f32),
                       ((0, P - w.shape[0]), (0, P - w.shape[1])))

    # TODO(synk): for production widths where (2L+1)*P*P*itemsize exceeds the
    # scoped VMEM budget (32 MiB default; 64 MiB physical on v7x), tile the
    # stacked weights along the feature axes instead of whole-array blocks.
    wg_s = jnp.stack([pad_w(w) for w in gating_weights]).astype(matmul_dtype)
    wv_s = jnp.stack([pad_w(w) for w in value_weights]).astype(matmul_dtype)
    bg_s = jnp.stack([jnp.pad(b.reshape(1, -1).astype(f32),
                              ((0, 0), (0, P - b.shape[-1])))
                      for b in gating_biases])                      # (L,1,P) f32

    pwc = (mode == 'pwc')

    kernel = functools.partial(
        _dlgn_fused_kernel, beta=float(beta), num_hidden_layers=L,
        pwc=pwc, matmul_dtype=matmul_dtype)

    act_spec = pl.BlockSpec((TB, P), lambda i: (i, 0))
    full3 = lambda shape: pl.BlockSpec(shape, lambda i: (0, 0, 0))

    in_arrays = [x_p]
    in_specs = [act_spec]
    if not pwc:
        in_arrays.append(x_p)       # value path starts from x when mode != 'pwc'
        in_specs.append(act_spec)
    in_arrays += [wg_s, bg_s, wv_s]
    in_specs += [full3(wg_s.shape), full3(bg_s.shape), full3(wv_s.shape)]

    out_shape = (
        jax.ShapeDtypeStruct((L, BP, P), f32),       # gate scores for layers 1..L
        jax.ShapeDtypeStruct((L + 1, BP, P), f32),   # values 1..L and final output
    )
    out_specs = (
        pl.BlockSpec((L, TB, P), lambda i: (0, i, 0)),
        pl.BlockSpec((L + 1, TB, P), lambda i: (0, i, 0)),
    )

    gs_pad, v_pad = pl.pallas_call(
        kernel,
        grid=(nb,),
        out_shape=out_shape,
        in_specs=in_specs,
        out_specs=out_specs,
        compiler_params=pltpu.CompilerParams(
            dimension_semantics=("parallel",)),
    )(*in_arrays)

    # Un-pad to the module's exact list semantics.
    gate_scores = [x] + [gs_pad[i, :B, :num_nodes[i + 1]] for i in range(L)]
    values = [jnp.ones_like(x) if pwc else x]
    values += [v_pad[i, :B, :num_nodes[i + 1]] for i in range(L + 1)]
    return values, gate_scores


# ----------------------------------------------------------------------------
# Deterministic parameter init (same shapes as DLGN_FC.__init__)
# ----------------------------------------------------------------------------
def init_dlgn_params(key, input_dim, output_dim, num_hidden_nodes):
    """Weights stored (in, out); biases (1, out) — the y = x @ W + b layout."""
    num_nodes = [input_dim] + list(num_hidden_nodes) + [output_dim]
    num_hidden_layers = len(num_hidden_nodes)

    gating_weights, gating_biases, value_weights = [], [], []
    for i in range(num_hidden_layers + 1):
        fan_in, fan_out = num_nodes[i], num_nodes[i + 1]
        bound = 1.0 / jnp.sqrt(fan_in)
        if i != num_hidden_layers:
            key, k1, k2 = jax.random.split(key, 3)
            gating_weights.append(
                jax.random.uniform(k1, (fan_in, fan_out), jnp.float32, -bound, bound))
            gating_biases.append(
                jax.random.uniform(k2, (1, fan_out), jnp.float32, -bound, bound))
        key, k3 = jax.random.split(key)
        value_weights.append(
            jax.random.uniform(k3, (fan_in, fan_out), jnp.float32, -bound, bound))
    return gating_weights, gating_biases, value_weights


# ----------------------------------------------------------------------------
# Pure-JAX reference (same math as the PyTorch forward)
# ----------------------------------------------------------------------------
def dlgn_fc_reference(x, gating_weights, gating_biases, value_weights,
                      beta=30.0, mode='pwc'):
    num_hidden_layers = len(gating_weights)
    gate_scores = [x]
    values = [jnp.ones_like(x)] if mode == 'pwc' else [x]
    for i in range(num_hidden_layers):
        gs = gate_scores[-1] @ gating_weights[i] + gating_biases[i]
        gate_scores.append(gs)
        gate = jax.nn.sigmoid(beta * gs)
        values.append((values[-1] @ value_weights[i]) * gate)
    values.append(values[-1] @ value_weights[num_hidden_layers])
    return values, gate_scores


if __name__ == "__main__":
    batch = 8
    input_dim = 16
    num_hidden_nodes = [32, 32]
    output_dim = 4
    beta = 30.0

    key = jax.random.PRNGKey(0)
    key, kx = jax.random.split(key)
    x = jax.random.normal(kx, (batch, input_dim), dtype=jnp.float32)

    gating_w, gating_b, value_w = init_dlgn_params(
        key, input_dim, output_dim, num_hidden_nodes)

    # --- f32 path, mode='pwc' (strict check vs reference) -------------------
    values, gate_scores = dlgn_fc_forward(
        x, gating_w, gating_b, value_w, beta=beta, mode='pwc')
    values = [jax.block_until_ready(v) for v in values]
    gate_scores = [jax.block_until_ready(g) for g in gate_scores]

    ref_values, ref_gate_scores = dlgn_fc_reference(
        x, gating_w, gating_b, value_w, beta=beta, mode='pwc')
    for a, b in zip(values, ref_values):
        assert a.shape == b.shape
        assert float(jnp.max(jnp.abs(a - b))) < 1e-4, "value mismatch (pwc)"
    for a, b in zip(gate_scores, ref_gate_scores):
        assert a.shape == b.shape
        assert float(jnp.max(jnp.abs(a - b))) < 1e-4, "gate_score mismatch (pwc)"

    # --- f32 path, non-pwc mode (value path starts from x) ------------------
    values_nl, gs_nl = dlgn_fc_forward(
        x, gating_w, gating_b, value_w, beta=beta, mode='pwl')
    values_nl = [jax.block_until_ready(v) for v in values_nl]
    ref_values_nl, ref_gs_nl = dlgn_fc_reference(
        x, gating_w, gating_b, value_w, beta=beta, mode='pwl')
    for a, b in zip(values_nl, ref_values_nl):
        assert a.shape == b.shape
        assert float(jnp.max(jnp.abs(a - b))) < 1e-4, "value mismatch (non-pwc)"
    for a, b in zip(gs_nl, ref_gs_nl):
        assert float(jnp.max(jnp.abs(a - b))) < 1e-4, "gate_score mismatch (non-pwc)"

    # --- bf16-operand MXU path (v5e/v6e-friendly): f32 accumulation ----------
    # Checked for shape / finiteness only; with beta=30 the sigmoid amplifies
    # bf16 operand rounding, so a tight elementwise tolerance is not meaningful.
    values_bf16, gs_bf16 = dlgn_fc_forward(
        x, gating_w, gating_b, value_w, beta=beta, mode='pwc',
        matmul_dtype=jnp.bfloat16)
    values_bf16 = [jax.block_until_ready(v) for v in values_bf16]
    for a, b in zip(values_bf16, ref_values):
        assert a.shape == b.shape
        assert bool(jnp.all(jnp.isfinite(a))), "non-finite value (bf16 path)"

    print("KERNEL_OK")
</pallas_src>

<mosaic_0001>
module attributes {stable_mosaic.version = 11 : i64} {
  func.func @_dlgn_fused_kernel(%arg0: i32, %arg1: memref<8x128xf32, #tpu.memory_space<vmem>>, %arg2: memref<2x128x128xf32, #tpu.memory_space<vmem>>, %arg3: memref<2x1x128xf32, #tpu.memory_space<vmem>>, %arg4: memref<3x128x128xf32, #tpu.memory_space<vmem>>, %arg5: memref<2x8x128xf32, #tpu.memory_space<vmem>>, %arg6: memref<3x8x128xf32, #tpu.memory_space<vmem>>) attributes {dimension_semantics = [#tpu.dimension_semantics<parallel>], iteration_bounds = array<i64: 1>, scalar_prefetch = 0 : i64, scratch_operands = 0 : i64, tpu.core_type = #tpu.core_type<tc>, window_params = [{transform_indices = @transform_0, window_bounds = array<i64: 8, 128>}, {pipeline_mode = #tpu.pipeline_mode<synchronous>, transform_indices = @transform_1, window_bounds = array<i64: 2, 128, 128>}, {pipeline_mode = #tpu.pipeline_mode<synchronous>, transform_indices = @transform_2, window_bounds = array<i64: 2, 1, 128>}, {pipeline_mode = #tpu.pipeline_mode<synchronous>, transform_indices = @transform_3, window_bounds = array<i64: 3, 128, 128>}, {transform_indices = @transform_4, window_bounds = array<i64: 2, 8, 128>}, {transform_indices = @transform_5, window_bounds = array<i64: 3, 8, 128>}]} {
    %c0 = arith.constant 0 : index
    %c0_0 = arith.constant 0 : index
    %0 = vector.load %arg1[%c0, %c0_0] : memref<8x128xf32, #tpu.memory_space<vmem>>, vector<8x128xf32>
    %c0_1 = arith.constant 0 : index
    %c0_2 = arith.constant 0 : index
    %c0_3 = arith.constant 0 : index
    %1 = vector.load %arg2[%c0_1, %c0_2, %c0_3] : memref<2x128x128xf32, #tpu.memory_space<vmem>>, vector<1x128x128xf32>
    %2 = vector.shape_cast %1 : vector<1x128x128xf32> to vector<128x128xf32>
    %cst = arith.constant dense<0.000000e+00> : vector<8x128xf32>
    %3 = tpu.matmul %0, %2, %cst {dimension_numbers = #tpu.dot_dimension_numbers<[1], [0], [0], [1], [0, 0, 1, 1], [], []>} : vector<8x128xf32>, vector<128x128xf32>, vector<8x128xf32> -> vector<8x128xf32>
    %c0_4 = arith.constant 0 : index
    %c0_5 = arith.constant 0 : index
    %c0_6 = arith.constant 0 : index
    %4 = vector.load %arg3[%c0_4, %c0_5, %c0_6] : memref<2x1x128xf32, #tpu.memory_space<vmem>>, vector<1x1x128xf32>
    %5 = vector.shape_cast %4 : vector<1x1x128xf32> to vector<1x128xf32>
    %6 = vector.broadcast %5 : vector<1x128xf32> to vector<8x128xf32>
    %7 = arith.addf %3, %6 : vector<8x128xf32>
    %cst_7 = arith.constant 3.000000e+01 : f32
    %8 = vector.broadcast %cst_7 : f32 to vector<8x128xf32>
    %9 = arith.mulf %8, %7 : vector<8x128xf32>
    %10 = arith.negf %9 : vector<8x128xf32>
    %11 = math.exp %10 : vector<8x128xf32>
    %cst_8 = arith.constant 1.000000e+00 : f32
    %12 = vector.broadcast %cst_8 : f32 to vector<8x128xf32>
    %13 = arith.addf %12, %11 : vector<8x128xf32>
    %14 = arith.divf %12, %13 : vector<8x128xf32>
    %c0_9 = arith.constant 0 : index
    %c0_10 = arith.constant 0 : index
    %c0_11 = arith.constant 0 : index
    %15 = vector.load %arg4[%c0_9, %c0_10, %c0_11] : memref<3x128x128xf32, #tpu.memory_space<vmem>>, vector<1x128x128xf32>
    %16 = vector.shape_cast %15 : vector<1x128x128xf32> to vector<128x128xf32>
    %cst_12 = arith.constant dense<0.000000e+00> : vector<128xf32>
    %17 = vector.multi_reduction <add>, %16, %cst_12 [0] : vector<128x128xf32> to vector<128xf32>
    %18 = vector.shape_cast %17 : vector<128xf32> to vector<1x128xf32>
    %19 = vector.shape_cast %18 : vector<1x128xf32> to vector<1x128xf32>
    %20 = vector.broadcast %19 : vector<1x128xf32> to vector<8x128xf32>
    %21 = arith.mulf %20, %14 : vector<8x128xf32>
    %c0_13 = arith.constant 0 : index
    %c0_14 = arith.constant 0 : index
    %c0_15 = arith.constant 0 : index
    %22 = vector.load %arg5[%c0_13, %c0_14, %c0_15] : memref<2x8x128xf32, #tpu.memory_space<vmem>>, vector<1x8x128xf32>
    %23 = vector.shape_cast %22 : vector<1x8x128xf32> to vector<8x128xf32>
    %24 = vector.shape_cast %7 : vector<8x128xf32> to vector<1x8x128xf32>
    tpu.vector_store %arg5[%c0_13, %c0_14, %c0_15], %24 {strides = array<i32>} : memref<2x8x128xf32, #tpu.memory_space<vmem>>, vector<1x8x128xf32>,
    %c0_16 = arith.constant 0 : index
    %c0_17 = arith.constant 0 : index
    %c0_18 = arith.constant 0 : index
    %25 = vector.load %arg6[%c0_16, %c0_17, %c0_18] : memref<3x8x128xf32, #tpu.memory_space<vmem>>, vector<1x8x128xf32>
    %26 = vector.shape_cast %25 : vector<1x8x128xf32> to vector<8x128xf32>
    %27 = vector.shape_cast %21 : vector<8x128xf32> to vector<1x8x128xf32>
    tpu.vector_store %arg6[%c0_16, %c0_17, %c0_18], %27 {strides = array<i32>} : memref<3x8x128xf32, #tpu.memory_space<vmem>>, vector<1x8x128xf32>,
    %c1 = arith.constant 1 : index
    %c0_19 = arith.constant 0 : index
    %c0_20 = arith.constant 0 : index
    %28 = vector.load %arg2[%c1, %c0_19, %c0_20] : memref<2x128x128xf32, #tpu.memory_space<vmem>>, vector<1x128x128xf32>
    %29 = vector.shape_cast %28 : vector<1x128x128xf32> to vector<128x128xf32>
    %cst_21 = arith.constant dense<0.000000e+00> : vector<8x128xf32>
    %30 = tpu.matmul %7, %29, %cst_21 {dimension_numbers = #tpu.dot_dimension_numbers<[1], [0], [0], [1], [0, 0, 1, 1], [], []>} : vector<8x128xf32>, vector<128x128xf32>, vector<8x128xf32> -> vector<8x128xf32>
    %c1_22 = arith.constant 1 : index
    %c0_23 = arith.constant 0 : index
    %c0_24 = arith.constant 0 : index
    %31 = vector.load %arg3[%c1_22, %c0_23, %c0_24] : memref<2x1x128xf32, #tpu.memory_space<vmem>>, vector<1x1x128xf32>
    %32 = vector.shape_cast %31 : vector<1x1x128xf32> to vector<1x128xf32>
    %33 = vector.broadcast %32 : vector<1x128xf32> to vector<8x128xf32>
    %34 = arith.addf %30, %33 : vector<8x128xf32>
    %cst_25 = arith.constant 3.000000e+01 : f32
    %35 = vector.broadcast %cst_25 : f32 to vector<8x128xf32>
    %36 = arith.mulf %35, %34 : vector<8x128xf32>
    %37 = arith.negf %36 : vector<8x128xf32>
    %38 = math.exp %37 : vector<8x128xf32>
    %cst_26 = arith.constant 1.000000e+00 : f32
    %39 = vector.broadcast %cst_26 : f32 to vector<8x128xf32>
    %40 = arith.addf %39, %38 : vector<8x128xf32>
    %41 = arith.divf %39, %40 : vector<8x128xf32>
    %c1_27 = arith.constant 1 : index
    %c0_28 = arith.constant 0 : index
    %c0_29 = arith.constant 0 : index
    %42 = vector.load %arg4[%c1_27, %c0_28, %c0_29] : memref<3x128x128xf32, #tpu.memory_space<vmem>>, vector<1x128x128xf32>
    %43 = vector.shape_cast %42 : vector<1x128x128xf32> to vector<128x128xf32>
    %cst_30 = arith.constant dense<0.000000e+00> : vector<8x128xf32>
    %44 = tpu.matmul %21, %43, %cst_30 {dimension_numbers = #tpu.dot_dimension_numbers<[1], [0], [0], [1], [0, 0, 1, 1], [], []>} : vector<8x128xf32>, vector<128x128xf32>, vector<8x128xf32> -> vector<8x128xf32>
    %45 = arith.mulf %44, %41 : vector<8x128xf32>
    %c1_31 = arith.constant 1 : index
    %c0_32 = arith.constant 0 : index
    %c0_33 = arith.constant 0 : index
    %46 = vector.load %arg5[%c1_31, %c0_32, %c0_33] : memref<2x8x128xf32, #tpu.memory_space<vmem>>, vector<1x8x128xf32>
    %47 = vector.shape_cast %46 : vector<1x8x128xf32> to vector<8x128xf32>
    %48 = vector.shape_cast %34 : vector<8x128xf32> to vector<1x8x128xf32>
    tpu.vector_store %arg5[%c1_31, %c0_32, %c0_33], %48 {strides = array<i32>} : memref<2x8x128xf32, #tpu.memory_space<vmem>>, vector<1x8x128xf32>,
    %c1_34 = arith.constant 1 : index
    %c0_35 = arith.constant 0 : index
    %c0_36 = arith.constant 0 : index
    %49 = vector.load %arg6[%c1_34, %c0_35, %c0_36] : memref<3x8x128xf32, #tpu.memory_space<vmem>>, vector<1x8x128xf32>
    %50 = vector.shape_cast %49 : vector<1x8x128xf32> to vector<8x128xf32>
    %51 = vector.shape_cast %45 : vector<8x128xf32> to vector<1x8x128xf32>
    tpu.vector_store %arg6[%c1_34, %c0_35, %c0_36], %51 {strides = array<i32>} : memref<3x8x128xf32, #tpu.memory_space<vmem>>, vector<1x8x128xf32>,
    %c2 = arith.constant 2 : index
    %c0_37 = arith.constant 0 : index
    %c0_38 = arith.constant 0 : index
    %52 = vector.load %arg4[%c2, %c0_37, %c0_38] : memref<3x128x128xf32, #tpu.memory_space<vmem>>, vector<1x128x128xf32>
    %53 = vector.shape_cast %52 : vector<1x128x128xf32> to vector<128x128xf32>
    %cst_39 = arith.constant dense<0.000000e+00> : vector<8x128xf32>
    %54 = tpu.matmul %45, %53, %cst_39 {dimension_numbers = #tpu.dot_dimension_numbers<[1], [0], [0], [1], [0, 0, 1, 1], [], []>} : vector<8x128xf32>, vector<128x128xf32>, vector<8x128xf32> -> vector<8x128xf32>
    %c2_40 = arith.constant 2 : index
    %c0_41 = arith.constant 0 : index
    %c0_42 = arith.constant 0 : index
    %55 = vector.load %arg6[%c2_40, %c0_41, %c0_42] : memref<3x8x128xf32, #tpu.memory_space<vmem>>, vector<1x8x128xf32>
    %56 = vector.shape_cast %55 : vector<1x8x128xf32> to vector<8x128xf32>
    %57 = vector.shape_cast %54 : vector<8x128xf32> to vector<1x8x128xf32>
    tpu.vector_store %arg6[%c2_40, %c0_41, %c0_42], %57 {strides = array<i32>} : memref<3x8x128xf32, #tpu.memory_space<vmem>>, vector<1x8x128xf32>,
    return
  }
  func.func @transform_0(%arg0: i32) -> (i32, i32) {
    %c0_i32 = arith.constant 0 : i32
    %c0_i32_0 = arith.constant 0 : i32
    return %arg0, %c0_i32 : i32, i32
  }
  func.func @transform_1(%arg0: i32) -> (i32, i32, i32) {
    %c0_i32 = arith.constant 0 : i32
    %c0_i32_0 = arith.constant 0 : i32
    %c0_i32_1 = arith.constant 0 : i32
    %c0_i32_2 = arith.constant 0 : i32
    return %c0_i32, %c0_i32_0, %c0_i32_1 : i32, i32, i32
  }
  func.func @transform_2(%arg0: i32) -> (i32, i32, i32) {
    %c0_i32 = arith.constant 0 : i32
    %c0_i32_0 = arith.constant 0 : i32
    %c0_i32_1 = arith.constant 0 : i32
    %c0_i32_2 = arith.constant 0 : i32
    return %c0_i32, %c0_i32_0, %c0_i32_1 : i32, i32, i32
  }
  func.func @transform_3(%arg0: i32) -> (i32, i32, i32) {
    %c0_i32 = arith.constant 0 : i32
    %c0_i32_0 = arith.constant 0 : i32
    %c0_i32_1 = arith.constant 0 : i32
    %c0_i32_2 = arith.constant 0 : i32
    return %c0_i32, %c0_i32_0, %c0_i32_1 : i32, i32, i32
  }
  func.func @transform_4(%arg0: i32) -> (i32, i32, i32) {
    %c0_i32 = arith.constant 0 : i32
    %c0_i32_0 = arith.constant 0 : i32
    %c0_i32_1 = arith.constant 0 : i32
    return %c0_i32, %arg0, %c0_i32_0 : i32, i32, i32
  }
  func.func @transform_5(%arg0: i32) -> (i32, i32, i32) {
    %c0_i32 = arith.constant 0 : i32
    %c0_i32_0 = arith.constant 0 : i32
    %c0_i32_1 = arith.constant 0 : i32
    return %c0_i32, %arg0, %c0_i32_0 : i32, i32, i32
  }
}

</mosaic_0001>

<bundles_post_ra>
// kernel: tpu_custom_call.1
= control target key start
LH: loop header
LB: loop body
LE: loop exit
PB: predicated region body
PF: predicated region fallthrough
CT: control target
= control target key end

     0   :  { %11 = vsyncpa [#allocation3], 0  ;;  %s1121_s0 = inlined_call_operand.hbm [shape: f32[8,128], index: 0, kind: input, shape index: {}]   ;;  %s1122_s1 = inlined_call_operand.hbm [shape: f32[2,128,128], index: 1, kind: input, shape index: {}]   ;;  %s1123_s2 = inlined_call_operand.vmem [shape: f32[2,1,128], index: 2, kind: input, shape index: {}]   ;;  %s1124_s3 = inlined_call_operand.hbm [shape: f32[3,128,128], index: 3, kind: input, shape index: {}]   ;;  %s1125_s4 = inlined_call_operand.hbm [shape: f32[2,8,128], index: 4, kind: output, shape index: {0}]   ;;  %s1126_s5 = inlined_call_operand.hbm [shape: f32[3,8,128], index: 5, kind: output, shape index: {1}]  }
   0x1   :  { %12 = vsyncpa [#allocation6], 0 }
   0x2   :  { %13 = vsyncpa [#allocation4], 0 }
   0x3   :  { %14 = vsyncpa [#allocation10], 0  ;;  %s963_s18 = smov [#allocation5]   ;;  %s845_s22 = scalar_lea.hbm %s1122_s1, 4096 }
   0x4   :  { %s30_s19 = sshll.u32 %s963_s18, 4  ;;  %p846_p0 = scmp.ne.s32.totalorder %s1122_s1, %s845_s22  ;;  %s31_s19 = int_to_ptr.vmem [resolvable:$true] %s30_s19 }
   0x5   :  { %p849_p1 = scmp.lt.u32.totalorder %s845_s22, %s1122_s1 }
   0x7   :  { %p851_p2 = pnand %p849_p1, %p846_p0 }
   0x9   :  { %854 = shalt.err (!%p851_p2)
}
   0xa   :  { %s855_s27 = scalar_lea.vmem %s31_s19, 4096  ;;  %p860_p4 = scmp.lt.s32.totalorder %s31_s19, %s31_s19 }
   0xb   :  { %p856_p3 = scmp.ne.s32.totalorder %s31_s19, %s855_s27  ;;  %p861_p5 = scmp.lt.s32.totalorder %s855_s27, %s855_s27 }
   0xd   :  { %p862_p6 = por %p861_p5, %p860_p4 }
   0xf   :  { %p863_p7 = pnand %p862_p6, %p856_p3 }
  0x11   :  { %866 = shalt.err (!%p863_p7)
}
  0x12   :  { %s964_s28 = smov 128   ;;  %s965_s29 = smov 8  }
  0x13   :  { %36 = dma.hbm_to_vmem [thread:$0]  %s1122_s1, 4096, %s31_s19, [#allocation6], %s964_s28, %s964_s28, %s965_s29  }
  0x14   :  { %s966_s7 = smov [#allocation2]   ;;  %s967_s9 = smov [#allocation7]  }
  0x15   :  { %s21_s8 = sshll.u32 %s966_s7, 4  ;;  %s44_s10 = sshll.u32 %s967_s9, 4  ;;  %s22_s8 = int_to_ptr.vmem [resolvable:$true] %s21_s8  ;;  %s45_s10 = int_to_ptr.vmem [resolvable:$true] %s44_s10 }
  0x16   :  { %s867_s13 = scalar_lea.hbm %s1121_s0, 128 }
  0x17   :  { %p868_p8 = scmp.ne.s32.totalorder %s1121_s0, %s867_s13  ;;  %p871_p9 = scmp.lt.u32.totalorder %s867_s13, %s1121_s0 }
  0x19   :  { %p873_p10 = pnand %p871_p9, %p868_p8 }
  0x1b   :  { %876 = shalt.err (!%p873_p10)
}
  0x1c   :  { %s877_s1 = scalar_lea.vmem %s22_s8, 128  ;;  %p882_p12 = scmp.lt.s32.totalorder %s22_s8, %s22_s8 }
  0x1d   :  { %p878_p11 = scmp.ne.s32.totalorder %s22_s8, %s877_s1  ;;  %p883_p13 = scmp.lt.s32.totalorder %s877_s1, %s877_s1 }
  0x1f   :  { %p884_p0 = por %p883_p13, %p882_p12 }
  0x21   :  { %p885_p1 = pnand %p884_p0, %p878_p11 }
  0x23   :  { %888 = shalt.err (!%p885_p1)
}
  0x24   :  { %24 = dma.hbm_to_vmem [thread:$0]  %s1121_s0, 128, %s22_s8, [#allocation3]  }
  0x25   :  { %s889_s22 = scalar_lea.hbm %s1124_s3, 6144 }
  0x26   :  { %p890_p2 = scmp.ne.s32.totalorder %s1124_s3, %s889_s22  ;;  %p893_p3 = scmp.lt.u32.totalorder %s889_s22, %s1124_s3 }
  0x28   :  { %p895_p4 = pnand %p893_p3, %p890_p2 }
  0x2a   :  { %898 = shalt.err (!%p895_p4)
}
  0x2b   :  { %s899_s27 = scalar_lea.vmem %s45_s10, 6144  ;;  %p904_p6 = scmp.lt.s32.totalorder %s45_s10, %s45_s10 }
  0x2c   :  { %p900_p5 = scmp.ne.s32.totalorder %s45_s10, %s899_s27  ;;  %p905_p7 = scmp.lt.s32.totalorder %s899_s27, %s899_s27 }
  0x2e   :  { %p906_p8 = por %p905_p7, %p904_p6 }
  0x30   :  { %p907_p9 = pnand %p906_p8, %p900_p5 }
  0x32   :  { %910 = shalt.err (!%p907_p9)
}
  0x33   :  { %50 = dma.hbm_to_vmem [thread:$0]  %s1124_s3, 6144, %s45_s10, [#allocation6], %s964_s28, %s964_s28, %s965_s29  }
  0x34   :  { %955 = dma.done.wait [#allocation3], 128  }
  0x35   :  { %956 = vsyncadd [#allocation3], 4294967168 }
  0x36   :  { %957 = dma.done.wait [#allocation6], 10240  }
  0x37   :  { %958 = vsyncadd [#allocation6], 4294957056  ;;  %v968_v0 = vmov 0.0|0.0   ;;  %vm969_vm0 = vmmov 0   ;;  %v970_v1 = vmov 0.0   ;;  %v61_v2 = vld [vmem:[#allocation5] sm:$0xff] }
  0x38   :  { %731 = vmatprep.subr.bf16.mxu0 %v968_v0  ;;  %623 = vmatprep.mubr.msk.f32.mxu0 %vm969_vm0, %v970_v1  ;;  %v62_v3 = vld [vmem:[#allocation5 + $0x8] sm:$0xff]  ;;  %v63_v4 = vld [vmem:[#allocation5 + $0x10] sm:$0xff]  ;;  %v64_v6 = vld [vmem:[#allocation5 + $0x18] sm:$0xff]  ;;  %s971_s9 = smov [#allocation8]  }
  0x39   :  { %755 = vmatprep.subr.bf16.mxu1 %v968_v0  ;;  %658 = vmatprep.mubr.msk.f32.mxu1 %vm969_vm0, %v970_v1  ;;  %v732_v5 = vpack.c.bf16 %v62_v3, %v61_v2  ;;  %v735_v7 = vpack.c.bf16 %v64_v6, %v63_v4  ;;  %v65_v8 = vld [vmem:[#allocation5 + $0x20] sm:$0xff]  ;;  %v66_v9 = vld [vmem:[#allocation5 + $0x28] sm:$0xff]  ;;  %v204_v12 = vld [vmem:[#allocation5 + $0x90] sm:$0xff]  ;;  %s489_s10 = sshll.u32 %s971_s9, 4  ;;  %s490_s10 = int_to_ptr.vmem [resolvable:$true] %s489_s10 }
  0x3a   :  { %v202_v10 = vld [vmem:[#allocation5 + $0x80] sm:$0xff]  ;;  %v203_v11 = vld [vmem:[#allocation5 + $0x88] sm:$0xff]  ;;  %v205_v13 = vld [vmem:[#allocation5 + $0x98] sm:$0xff]  ;;  %v738_v14 = vpack.c.bf16 %v66_v9, %v65_v8  ;;  %p916_p11 = scmp.lt.s32.totalorder %s490_s10, %s490_s10 }
  0x3b   :  { %733 = vmatpush3.bf16.msra.mxu0 %v732_v5  ;;  %v756_v15 = vpack.c.bf16 %v203_v11, %v202_v10  ;;  %v67_v16 = vld [vmem:[#allocation5 + $0x30] sm:$0xff]  ;;  %v68_v17 = vld [vmem:[#allocation5 + $0x38] sm:$0xff]  ;;  %v759_v18 = vpack.c.bf16 %v205_v13, %v204_v12  ;;  %v206_v19 = vld [vmem:[#allocation5 + $0xa0] sm:$0xff] }
  0x3c   :  { %734 = vmatprep.subr.bf16.mxu0 %v968_v0  ;;  %v207_v20 = vld [vmem:[#allocation5 + $0xa8] sm:$0xff]  ;;  %v741_v21 = vpack.c.bf16 %v68_v17, %v67_v16  ;;  %v69_v22 = vld [vmem:[#allocation5 + $0x40] sm:$0xff]  ;;  %v208_v25 = vld [vmem:[#allocation5 + $0xb0] sm:$0xff] }
  0x3d   :  { %757 = vmatpush3.bf16.msra.mxu1 %v756_v15  ;;  %v70_v23 = vld [vmem:[#allocation5 + $0x48] sm:$0xff]  ;;  %v762_v24 = vpack.c.bf16 %v207_v20, %v206_v19  ;;  %v209_v26 = vld [vmem:[#allocation5 + $0xb8] sm:$0xff]  ;;  %v71_v28 = vld [vmem:[#allocation5 + $0x50] sm:$0xff] }
  0x3e   :  { %758 = vmatprep.subr.bf16.mxu1 %v968_v0  ;;  %v744_v27 = vpack.c.bf16 %v70_v23, %v69_v22  ;;  %v72_v29 = vld [vmem:[#allocation5 + $0x58] sm:$0xff]  ;;  %v765_v30 = vpack.c.bf16 %v209_v26, %v208_v25  ;;  %v210_v31 = vld [vmem:[#allocation5 + $0xc0] sm:$0xff]  ;;  %v211_v32 = vld [vmem:[#allocation5 + $0xc8] sm:$0xff] }
  0x3f   :  { %736 = vmatpush3.bf16.msra.mxu0 %v735_v7  ;;  %v747_v33 = vpack.c.bf16 %v72_v29, %v71_v28  ;;  %v73_v34 = vld [vmem:[#allocation5 + $0x60] sm:$0xff]  ;;  %v74_v35 = vld [vmem:[#allocation5 + $0x68] sm:$0xff]  ;;  %v768_v36 = vpack.c.bf16 %v211_v32, %v210_v31  ;;  %v212_v37 = vld [vmem:[#allocation5 + $0xd0] sm:$0xff] }
  0x40   :  { %737 = vmatprep.subr.bf16.mxu0 %v968_v0  ;;  %v213_v38 = vld [vmem:[#allocation5 + $0xd8] sm:$0xff]  ;;  %v750_v39 = vpack.c.bf16 %v74_v35, %v73_v34  ;;  %v75_v40 = vld [vmem:[#allocation5 + $0x70] sm:$0xff]  ;;  %v214_v43 = vld [vmem:[#allocation5 + $0xe0] sm:$0xff] }
  0x41   :  { %760 = vmatpush3.bf16.msra.mxu1 %v759_v18  ;;  %v76_v41 = vld [vmem:[#allocation5 + $0x78] sm:$0xff]  ;;  %v771_v42 = vpack.c.bf16 %v213_v38, %v212_v37  ;;  %v215_v44 = vld [vmem:[#allocation5 + $0xe8] sm:$0xff]  ;;  %v216_v48 = vld [vmem:[#allocation5 + $0xf0] sm:$0xff] }
  0x42   :  { %761 = vmatprep.subr.bf16.mxu1 %v968_v0  ;;  %v753_v45 = vpack.c.bf16 %v76_v41, %v75_v40  ;;  %v774_v46 = vpack.c.bf16 %v215_v44, %v214_v43  ;;  %v60_v47 = vld [vmem:[#allocation2] sm:$0xff]  ;;  %v304_v51 = vld [vmem:[#allocation7 + $0x80] sm:$0xff]  ;;  %v305_v52 = vld [vmem:[#allocation7 + $0x88] sm:$0xff] }
  0x43   :  { %739 = vmatpush3.bf16.msra.mxu0 %v738_v14  ;;  %v217_v49 = vld [vmem:[#allocation5 + $0xf8] sm:$0xff]  ;;  %v780_v53 = vpack.c.bf16 %v305_v52, %v304_v51  ;;  %v306_v54 = vld [vmem:[#allocation7 + $0x90] sm:$0xff]  ;;  %v308_v57 = vld [vmem:[#allocation7 + $0xa0] sm:$0xff] }
  0x44   :  { %740 = vmatprep.subr.bf16.mxu0 %v968_v0  ;;  %v777_v50 = vpack.c.bf16 %v217_v49, %v216_v48  ;;  %v307_v55 = vld [vmem:[#allocation7 + $0x98] sm:$0xff]  ;;  %v309_v58 = vld [vmem:[#allocation7 + $0xa8] sm:$0xff]  ;;  %v310_v60 = vld [vmem:[#allocation7 + $0xb0] sm:$0xff] }
  0x45   :  { %763 = vmatpush3.bf16.msra.mxu1 %v762_v24  ;;  %v783_v56 = vpack.c.bf16 %v307_v55, %v306_v54  ;;  %v786_v59 = vpack.c.bf16 %v309_v58, %v308_v57  ;;  %v311_v61 = vld [vmem:[#allocation7 + $0xb8] sm:$0xff]  ;;  %v312_v63 = vld [vmem:[#allocation7 + $0xc0] sm:$0xff]  ;;  %v313_v2 = vld [vmem:[#allocation7 + $0xc8] sm:$0xff] }
  0x46   :  { %764 = vmatprep.subr.bf16.mxu1 %v968_v0  ;;  %v789_v62 = vpack.c.bf16 %v311_v61, %v310_v60  ;;  %v792_v3 = vpack.c.bf16 %v313_v2, %v312_v63  ;;  %v314_v4 = vld [vmem:[#allocation7 + $0xd0] sm:$0xff]  ;;  %v315_v5 = vld [vmem:[#allocation7 + $0xd8] sm:$0xff]  ;;  %v316_v7 = vld [vmem:[#allocation7 + $0xe0] sm:$0xff] }
  0x47   :  { %742 = vmatpush3.bf16.msra.mxu0 %v741_v21  ;;  %v795_v6 = vpack.c.bf16 %v315_v5, %v314_v4  ;;  %v317_v8 = vld [vmem:[#allocation7 + $0xe8] sm:$0xff]  ;;  %v318_v10 = vld [vmem:[#allocation7 + $0xf0] sm:$0xff]  ;;  %v319_v11 = vld [vmem:[#allocation7 + $0xf8] sm:$0xff] }
  0x48   :  { %743 = vmatprep.subr.bf16.mxu0 %v968_v0  ;;  %v798_v9 = vpack.c.bf16 %v317_v8, %v316_v7  ;;  %v801_v12 = vpack.c.bf16 %v319_v11, %v318_v10  ;;  %v161_v13 = vld [vmem:[#allocation7] sm:$0xff]  ;;  %v162_v14 = vld [vmem:[#allocation7 + $0x8] sm:$0xff]  ;;  %v163_v16 = vld [vmem:[#allocation7 + $0x10] sm:$0xff] }
  0x49   :  { %766 = vmatpush3.bf16.msra.mxu1 %v765_v30  ;;  %v177_v15 = vadd.f32 %v162_v14, %v161_v13  ;;  %v164_v18 = vld [vmem:[#allocation7 + $0x18] sm:$0xff]  ;;  %v165_v20 = vld [vmem:[#allocation7 + $0x20] sm:$0xff]  ;;  %v166_v22 = vld [vmem:[#allocation7 + $0x28] sm:$0xff] }
  0x4a   :  { %767 = vmatprep.subr.bf16.mxu1 %v968_v0  ;;  %v167_v24 = vld [vmem:[#allocation7 + $0x30] sm:$0xff]  ;;  %v168_v26 = vld [vmem:[#allocation7 + $0x38] sm:$0xff]  ;;  %v169_v28 = vld [vmem:[#allocation7 + $0x40] sm:$0xff] }
  0x4b   :  { %745 = vmatpush3.bf16.msra.mxu0 %v744_v27  ;;  %v178_v17 = vadd.f32 %v177_v15, %v163_v16  ;;  %v170_v30 = vld [vmem:[#allocation7 + $0x48] sm:$0xff]  ;;  %v171_v32 = vld [vmem:[#allocation7 + $0x50] sm:$0xff]  ;;  %v172_v34 = vld [vmem:[#allocation7 + $0x58] sm:$0xff] }
  0x4c   :  { %746 = vmatprep.subr.bf16.mxu0 %v968_v0  ;;  %v174_v38 = vld [vmem:[#allocation7 + $0x68] sm:$0xff]  ;;  %v175_v40 = vld [vmem:[#allocation7 + $0x70] sm:$0xff]  ;;  %v518_v41 = vld [vmem:[%s1123_s2] ss:$0 sm:$0xff] }
  0x4d   :  { %769 = vmatpush3.bf16.msra.mxu1 %v768_v36  ;;  %v179_v19 = vadd.f32 %v178_v17, %v164_v18  ;;  %v173_v36 = vld [vmem:[#allocation7 + $0x60] sm:$0xff]  ;;  %v176_v44 = vld [vmem:[#allocation7 + $0x78] sm:$0xff]  ;;  %v397_v61 = vld [vmem:[#allocation7 + $0x108] sm:$0xff] }
  0x4e   :  { %770 = vmatprep.subr.bf16.mxu1 %v968_v0  ;;  %v396_v60 = vld [vmem:[#allocation7 + $0x100] sm:$0xff]  ;;  %v399_v63 = vld [vmem:[#allocation7 + $0x118] sm:$0xff]  ;;  %v401_v4 = vld [vmem:[#allocation7 + $0x128] sm:$0xff] }
  0x4f   :  { %748 = vmatpush3.bf16.msra.mxu0 %v747_v33  ;;  %v180_v21 = vadd.f32 %v179_v19, %v165_v20  ;;  %v403_v7 = vld [vmem:[#allocation7 + $0x138] sm:$0xff]  ;;  %v405_v10 = vld [vmem:[#allocation7 + $0x148] sm:$0xff]  ;;  %v408_v15 = vld [vmem:[#allocation7 + $0x160] sm:$0xff] }
  0x50   :  { %749 = vmatprep.subr.bf16.mxu0 %v968_v0  ;;  %v407_v13 = vld [vmem:[#allocation7 + $0x158] sm:$0xff]  ;;  %v409_v16 = vld [vmem:[#allocation7 + $0x168] sm:$0xff]  ;;  %v410_v18 = vld [vmem:[#allocation7 + $0x170] sm:$0xff] }
  0x51   :  { %772 = vmatpush3.bf16.msra.mxu1 %v771_v42  ;;  %v181_v23 = vadd.f32 %v180_v21, %v166_v22  ;;  %v822_v17 = vpack.c.bf16 %v409_v16, %v408_v15  ;;  %v411_v19 = vld [vmem:[#allocation7 + $0x178] sm:$0xff] }
  0x52   :  { %773 = vmatprep.subr.bf16.mxu1 %v968_v0  ;;  %v825_v20 = vpack.c.bf16 %v411_v19, %v410_v18  ;;  %v521_v21 = vld [vmem:[%s1123_s2 + $0x1] ss:$0 sm:$0xff]  ;;  %s911_s2 = scalar_lea.vmem %s490_s10, 256 }
  0x53   :  { %751 = vmatpush3.bf16.msra.mxu0 %v750_v39  ;;  %v182_v25 = vadd.f32 %v181_v23, %v167_v24  ;;  %p912_p10 = scmp.ne.s32.totalorder %s490_s10, %s911_s2  ;;  %p917_p12 = scmp.lt.s32.totalorder %s911_s2, %s911_s2 }
  0x54   :  { %752 = vmatprep.subr.bf16.mxu0 %v968_v0 }
  0x55   :  { %775 = vmatpush3.bf16.msra.mxu1 %v774_v46  ;;  %v183_v27 = vadd.f32 %v182_v25, %v168_v26  ;;  %p918_p13 = por %p917_p12, %p916_p11 }
  0x56   :  { %776 = vmatprep.subr.bf16.mxu1 %v968_v0 }
  0x57   :  { %754 = vmatpush3.bf16.msra.mxu0 %v753_v45  ;;  %v184_v29 = vadd.f32 %v183_v27, %v169_v28  ;;  %p919_p0 = pnand %p918_p13, %p912_p10 }
  0x58   :  { %779 = vmatprep.subr.bf16.mxu0 %v968_v0 }
  0x59   :  { %778 = vmatpush3.bf16.msra.mxu1 %v777_v50  ;;  %v185_v31 = vadd.f32 %v184_v29, %v170_v30 }
  0x5a   :  { %624 = vmatmul.mubr.f32.vlgmr.msra.gmra.mrb[0].mxu0 %v60_v47  ;;  %803 = vmatprep.subr.bf16.mxu1 %v968_v0 }
  0x5b   :  { %693 = vmatprep.mubr.msk.f32.mxu0 %vm969_vm0, %v970_v1  ;;  %781 = vmatpush3.bf16.msra.mxu0 %v780_v53  ;;  %v186_v33 = vadd.f32 %v185_v31, %v171_v32 }
  0x5c   :  { %782 = vmatprep.subr.bf16.mxu0 %v968_v0 }
  0x5d   :  { %v187_v35 = vadd.f32 %v186_v33, %v172_v34 }
  0x5f   :  { %784 = vmatpush3.bf16.msra.mxu0 %v783_v56  ;;  %v188_v37 = vadd.f32 %v187_v35, %v173_v36 }
  0x60   :  { %785 = vmatprep.subr.bf16.mxu0 %v968_v0 }
  0x61   :  { %v189_v39 = vadd.f32 %v188_v37, %v174_v38 }
  0x63   :  { %787 = vmatpush3.bf16.msra.mxu0 %v786_v59  ;;  %v190_v42 = vadd.f32 %v189_v39, %v175_v40 }
  0x64   :  { %788 = vmatprep.subr.bf16.mxu0 %v968_v0 }
  0x65   :  { %v191_v48 = vadd.f32 %v190_v42, %v176_v44 }
  0x67   :  { %790 = vmatpush3.bf16.msra.mxu0 %v789_v62  ;;  %v192_v50 = vrot.slane %v191_v48, 4  ;;  %v804_v62 = vpack.c.bf16 %v397_v61, %v396_v60 }
  0x68   :  { %791 = vmatprep.subr.bf16.mxu0 %v968_v0 }
  0x69   :  { %v193_v51 = vadd.f32 %v192_v50, %v191_v48 }
  0x6b   :  { %793 = vmatpush3.bf16.msra.mxu0 %v792_v3  ;;  %v194_v52 = vrot.slane %v193_v51, 2  ;;  %v400_v3 = vld [vmem:[#allocation7 + $0x120] sm:$0xff] }
  0x6c   :  { %794 = vmatprep.subr.bf16.mxu0 %v968_v0  ;;  %v810_v5 = vpack.c.bf16 %v401_v4, %v400_v3 }
  0x6d   :  { %v195_v55 = vadd.f32 %v194_v52, %v193_v51 }
  0x6f   :  { %796 = vmatpush3.bf16.msra.mxu0 %v795_v6  ;;  %v196_v56 = vrot.slane %v195_v55, 1  ;;  %v402_v6 = vld [vmem:[#allocation7 + $0x130] sm:$0xff] }
  0x70   :  { %797 = vmatprep.subr.bf16.mxu0 %v968_v0  ;;  %v813_v8 = vpack.c.bf16 %v403_v7, %v402_v6 }
  0x71   :  { %v197_v57 = vadd.f32 %v196_v56, %v195_v55 }
  0x73   :  { %799 = vmatpush3.bf16.msra.mxu0 %v798_v9  ;;  %v404_v9 = vld [vmem:[#allocation7 + $0x140] sm:$0xff] }
  0x74   :  { %800 = vmatprep.subr.bf16.mxu0 %v968_v0  ;;  %v816_v11 = vpack.c.bf16 %v405_v10, %v404_v9 }
  0x77   :  { %802 = vmatpush3.bf16.msra.mxu0 %v801_v12  ;;  %v406_v12 = vld [vmem:[#allocation7 + $0x150] sm:$0xff] }
  0x78   :  { %v819_v14 = vpack.c.bf16 %v407_v13, %v406_v12 }
 0x12d   :  { %v150_v43 = vpop.f32.mrb[0].mxu0 }
 0x12e   :  { %v151_v45 = vadd.f32 %v518_v41, %v150_v43  ;;  %v625_v46 = vpop.f32.mrb[1].mxu0 }
 0x130   :  { %v519_v47 = vmul.f32 -30.0, %v151_v45  ;;  %199 = vst [vmem:[#allocation8] sm:$0xff] %v151_v45  ;;  %659 = vmatmul.mubr.f32.vlgmr.msra.gmra.mrb[0].mxu1 %v151_v45 }
 0x131   :  { %728 = vmatprep.mubr.msk.f32.mxu1 %vm969_vm0, %v970_v1  ;;  %805 = vmatpush3.bf16.msra.mxu1 %v804_v62  ;;  %v398_v1 = vld [vmem:[#allocation7 + $0x110] sm:$0xff] }
 0x132   :  { %v156_v49 = vmul.f32 1.442695, %v519_v47  ;;  %806 = vmatprep.subr.bf16.mxu1 %v968_v0  ;;  %v807_v2 = vpack.c.bf16 %v399_v63, %v398_v1 }
 0x134   :  { %837 = vpow2.f32 %v156_v49 }
 0x135   :  { %808 = vmatpush3.bf16.msra.mxu1 %v807_v2 }
 0x136   :  { %809 = vmatprep.subr.bf16.mxu1 %v968_v0 }
 0x139   :  { %811 = vmatpush3.bf16.msra.mxu1 %v810_v5 }
 0x13a   :  { %812 = vmatprep.subr.bf16.mxu1 %v968_v0 }
 0x13d   :  { %814 = vmatpush3.bf16.msra.mxu1 %v813_v8 }
 0x13e   :  { %v838_v53 = vpop.eup %837  ;;  %815 = vmatprep.subr.bf16.mxu1 %v968_v0 }
 0x13f   :  { %v158_v54 = vadd.f32 1.0, %v838_v53 }
 0x141   :  { %839 = vrcp.f32 %v158_v54  ;;  %817 = vmatpush3.bf16.msra.mxu1 %v816_v11 }
 0x142   :  { %818 = vmatprep.subr.bf16.mxu1 %v968_v0 }
 0x145   :  { %820 = vmatpush3.bf16.msra.mxu1 %v819_v14 }
 0x146   :  { %821 = vmatprep.subr.bf16.mxu1 %v968_v0 }
 0x149   :  { %823 = vmatpush3.bf16.msra.mxu1 %v822_v17 }
 0x14a   :  { %824 = vmatprep.subr.bf16.mxu1 %v968_v0 }
 0x14b   :  { %v840_v58 = vpop.eup %839 }
 0x14c   :  { %v198_v59 = vmul.f32 %v840_v58, %v197_v57 }
 0x14d   :  { %826 = vmatpush3.bf16.msra.mxu1 %v825_v20 }
 0x14e   :  { %694 = vmatmul.mubr.f32.vlgmr.msra.gmra.mrb[2].mxu0 %v198_v59  ;;  %200 = vst [vmem:[#allocation9] sm:$0xff] %v198_v59 }
 0x203   :  { %v292_v22 = vpop.f32.mrb[0].mxu1 }
 0x204   :  { %v293_v23 = vadd.f32 %v521_v21, %v292_v22  ;;  %v660_v24 = vpop.f32.mrb[1].mxu1 }
 0x206   :  { %v522_v25 = vmul.f32 -30.0, %v293_v23  ;;  %392 = vst [vmem:[#allocation8 + $0x8] sm:$0xff] %v293_v23 }
 0x208   :  { %v298_v26 = vmul.f32 1.442695, %v522_v25 }
 0x20a   :  { %841 = vpow2.f32 %v298_v26 }
 0x214   :  { %v842_v27 = vpop.eup %841 }
 0x215   :  { %v300_v28 = vadd.f32 1.0, %v842_v27 }
 0x217   :  { %843 = vrcp.f32 %v300_v28 }
 0x221   :  { %v844_v29 = vpop.eup %843  ;;  %v386_v0 = vpop.f32.mrb[2].mxu0 }
 0x222   :  { %v390_v30 = vmul.f32 %v844_v29, %v386_v0  ;;  %v695_v31 = vpop.f32.mrb[3].mxu0 }
 0x224   :  { %394 = vst [vmem:[#allocation9 + $0x8] sm:$0xff] %v390_v30  ;;  %729 = vmatmul.mubr.f32.vlgmr.msra.gmra.mrb[2].mxu1 %v390_v30 }
 0x225   :  { %922 = shalt.err (!%p919_p0)
}
 0x226   :  { %s923_s13 = scalar_lea.hbm %s1125_s4, 256 }
 0x227   :  { %p924_p1 = scmp.ne.s32.totalorder %s1125_s4, %s923_s13  ;;  %p927_p2 = scmp.lt.u32.totalorder %s923_s13, %s1125_s4 }
 0x229   :  { %p929_p3 = pnand %p927_p2, %p924_p1 }
 0x22b   :  { %932 = shalt.err (!%p929_p3)
}
 0x22c   :  { %495 = dma.vmem_to_hbm [thread:$0]  %s490_s10, 256, %s1125_s4, [#allocation4], %s964_s28, %s964_s28, %s965_s29  }
 0x22d   :  { %s972_s19 = smov [#allocation9]  }
 0x22e   :  { %s501_s20 = sshll.u32 %s972_s19, 4  ;;  %s502_s20 = int_to_ptr.vmem [resolvable:$true] %s501_s20 }
 0x22f   :  { %s933_s21 = scalar_lea.vmem %s502_s20, 384  ;;  %p938_p5 = scmp.lt.s32.totalorder %s502_s20, %s502_s20 }
 0x230   :  { %p934_p4 = scmp.ne.s32.totalorder %s502_s20, %s933_s21  ;;  %p939_p6 = scmp.lt.s32.totalorder %s933_s21, %s933_s21 }
 0x232   :  { %p940_p7 = por %p939_p6, %p938_p5 }
 0x234   :  { %p941_p8 = pnand %p940_p7, %p934_p4 }
 0x2f7   :  { %v478_v32 = vpop.f32.mrb[2].mxu1 }
 0x2f8   :  { %483 = vst [vmem:[#allocation9 + $0x10] sm:$0xff] %v478_v32  ;;  %v730_v33 = vpop.f32.mrb[3].mxu1 }
 0x2f9   :  { %944 = shalt.err (!%p941_p8)
}
 0x2fa   :  { %s945_s24 = scalar_lea.hbm %s1126_s5, 384 }
 0x2fb   :  { %p946_p9 = scmp.ne.s32.totalorder %s1126_s5, %s945_s24  ;;  %p949_p10 = scmp.lt.u32.totalorder %s945_s24, %s1126_s5 }
 0x2fd   :  { %p951_p11 = pnand %p949_p10, %p946_p9 }
 0x2ff   :  { %954 = shalt.err (!%p951_p11)
}
 0x300   :  { %507 = dma.vmem_to_hbm [thread:$0]  %s502_s20, 384, %s1126_s5, [#allocation10], %s964_s28, %s964_s28, %s965_s29  }
 0x301   :  { %959 = dma.done.wait [#allocation4], 256  }
 0x302   :  { %960 = vsyncadd [#allocation4], 4294967040 }
 0x303   :  { %961 = dma.done.wait [#allocation10], 384  }
 0x304   :  { %962 = vsyncadd [#allocation10], 4294966912 }
 0x305   :  { %514 = vsyncpa [#allocation3], 1 }
 0x306   :  { %515 = vsyncpa [#allocation6], 1 }
 0x307   :  { %516 = vsyncpa [#allocation4], 1 }
 0x308   :  { %517 = vsyncpa [#allocation10], 1 }

</bundles_post_ra>
